<compile_context>
chip_gen: v7x
topology: tpu7x:2x2x1
jax: 0.10.0
libtpu: 0.0.40
codegen_flags: <defaults>
</compile_context>

<pallas_src>
import functools

import jax
import jax.numpy as jnp
from jax.experimental import pallas as pl
from jax.experimental.pallas import tpu as pltpu


def _round_up(x, m):
    return ((x + m - 1) // m) * m


def twinq_kernel(sa_ref, w1_ref, b1_ref,
                 w2a_ref, b2a_ref, w2b_ref, b2b_ref,
                 w3a_ref, w3b_ref, b3_ref,
                 q_ref):
    """One batch tile: both Q heads, single fused layer-1 matmul, bf16 MXU /
    f32 accumulation, lane-dense (TB, 128) output (q1 in lane 0, q2 in lane 1)."""
    Hp = w2a_ref.shape[0]

    # Fused layer 1 for both heads: one K-pass over [S+A] -> [TB, 2Hp].
    h1 = (jnp.dot(sa_ref[...], w1_ref[...],
                  preferred_element_type=jnp.float32)
          + b1_ref[...])
    h1 = jnp.maximum(h1, 0.0).astype(jnp.bfloat16)
    h1a = h1[:, :Hp]          # Hp is a multiple of 128 -> aligned lane slice
    h1b = h1[:, Hp:]

    # Layer 2, per head: [TB, Hp]
    h2a = jnp.maximum(
        jnp.dot(h1a, w2a_ref[...], preferred_element_type=jnp.float32)
        + b2a_ref[...], 0.0)
    h2b = jnp.maximum(
        jnp.dot(h1b, w2b_ref[...], preferred_element_type=jnp.float32)
        + b2b_ref[...], 0.0)

    # Output layer (single unit): broadcast-mul + lane reduce (XLU slot),
    # avoiding an N=1 MXU matmul.  w3 is pre-shaped [1, Hp] f32; b3 in SMEM.
    q1 = jnp.sum(h2a * w3a_ref[...], axis=-1, keepdims=True) + b3_ref[0, 0]
    q2 = jnp.sum(h2b * w3b_ref[...], axis=-1, keepdims=True) + b3_ref[0, 1]

    # Lane-dense store: q1 -> lane 0, q2 -> lane 1, zeros elsewhere.
    lane = jax.lax.broadcasted_iota(jnp.int32, q_ref.shape, 1)
    q_ref[...] = jnp.where(lane == 0, q1, 0.0) + jnp.where(lane == 1, q2, 0.0)


@functools.partial(jax.jit, static_argnames=("tile_b",))
def twinq_forward(state, action, params, *, tile_b=1024):
    """params: packed kernel params from pack_twinq_params()."""
    # Concatenate on the host and feed bf16 directly (matmul inputs are bf16
    # anyway); halves input HBM traffic and removes in-kernel casts.
    sa = jnp.concatenate([state.astype(jnp.bfloat16),
                          action.astype(jnp.bfloat16)], axis=1)
    B, SA = sa.shape
    Hp = params["w2_q1"].shape[0]

    # Batch tile: multiple of 8; cap at ceil(B/2) (rounded to 8) so the
    # "parallel" batch axis has >= 2 grid steps and shards across both
    # TensorCores on megacore parts (v7x).
    B8 = _round_up(B, 8)
    target = min(tile_b, B8)
    if B8 >= 16:
        target = min(target, _round_up((B8 + 1) // 2, 8))
    TB = max(8, (target // 8) * 8)
    B_pad = _round_up(B, TB)
    if B_pad != B:
        sa = jnp.pad(sa, ((0, B_pad - B), (0, 0)))
    grid = (B_pad // TB,)

    def resident_spec(arr):
        # Constant block index -> weight stays VMEM-resident across grid steps.
        return pl.BlockSpec(arr.shape, lambda i: (0, 0))

    smem_spec = pl.BlockSpec((1, 2), lambda i: (0, 0),
                             memory_space=pltpu.MemorySpace.SMEM)

    flops = 2 * B_pad * (SA * 2 * Hp + 2 * Hp * Hp + 2 * Hp)
    bytes_accessed = (2 * B_pad * SA                       # bf16 input
                      + 4 * B_pad * 128                    # f32 output slab
                      + 2 * (SA * 2 * Hp + 2 * Hp * Hp)    # bf16 weights
                      + 4 * (2 * Hp + 2 * Hp + 2 * Hp + 2))  # f32 biases + w3

    q = pl.pallas_call(
        twinq_kernel,
        out_shape=jax.ShapeDtypeStruct((B_pad, 128), jnp.float32),
        grid=grid,
        in_specs=[
            pl.BlockSpec((TB, SA), lambda i: (i, 0)),
            resident_spec(params["w1"]),
            resident_spec(params["b1"]),
            resident_spec(params["w2_q1"]),
            resident_spec(params["b2_q1"]),
            resident_spec(params["w2_q2"]),
            resident_spec(params["b2_q2"]),
            resident_spec(params["w3_q1"]),
            resident_spec(params["w3_q2"]),
            smem_spec,
        ],
        out_specs=pl.BlockSpec((TB, 128), lambda i: (i, 0)),
        compiler_params=pltpu.CompilerParams(
            dimension_semantics=("parallel",),
            # Explicit limit so large batch tiles also compile on v5e
            # (16 MiB default scoped VMEM); still <= physical on v7x.
            vmem_limit_bytes=64 * 1024 * 1024),
        cost_estimate=pl.CostEstimate(flops=flops, transcendentals=0,
                                      bytes_accessed=bytes_accessed),
    )(sa,
      params["w1"], params["b1"],
      params["w2_q1"], params["b2_q1"], params["w2_q2"], params["b2_q2"],
      params["w3_q1"], params["w3_q2"], params["b3"])

    # PyTorch Squeeze(-1): [B, 1] -> [B]  (here: slice lanes 0/1 of the slab).
    return q[:B, 0], q[:B, 1]


# --------------------------- parameter handling ---------------------------

def init_linear(key, in_dim, out_dim):
    """Mimics torch.nn.Linear default init (U(-1/sqrt(in), 1/sqrt(in)))."""
    kw, kb = jax.random.split(key)
    bound = 1.0 / jnp.sqrt(jnp.float32(in_dim))
    w = jax.random.uniform(kw, (in_dim, out_dim), jnp.float32, -bound, bound)
    b = jax.random.uniform(kb, (1, out_dim), jnp.float32, -bound, bound)
    return w, b


def init_twinq(key, state_dim, action_dim, hidden_dim=256, n_hidden=2):
    assert n_hidden == 2, "kernel is written for the default n_hidden=2"
    dims = [state_dim + action_dim, hidden_dim, hidden_dim, 1]
    raw = {}
    for name in ("q1", "q2"):
        key, k1, k2, k3 = jax.random.split(key, 4)
        w1, b1 = init_linear(k1, dims[0], dims[1])
        w2, b2 = init_linear(k2, dims[1], dims[2])
        w3, b3 = init_linear(k3, dims[2], dims[3])
        raw[name] = (w1, b1, w2, b2, w3, b3)
    return raw


def pack_twinq_params(raw):
    """Pack raw per-head f32 params into kernel-ready form.

    hidden_dim is zero-padded to a multiple of 128 (exact: padded units have
    zero weights and biases, so they stay 0 through ReLU and contribute
    nothing), keeping all lane slices / matmul dims (8,128)-aligned.
    """
    w1_1, b1_1, w2_1, b2_1, w3_1, b3_1 = raw["q1"]
    w1_2, b1_2, w2_2, b2_2, w3_2, b3_2 = raw["q2"]
    H = w2_1.shape[0]
    Hp = _round_up(H, 128)
    ph = Hp - H

    def pad_cols(x):   # pad last dim H -> Hp with zeros
        return jnp.pad(x, ((0, 0), (0, ph)))

    def pad_both(x):   # pad (H, H) -> (Hp, Hp) with zeros
        return jnp.pad(x, ((0, ph), (0, ph)))

    w1 = jnp.concatenate([pad_cols(w1_1), pad_cols(w1_2)], axis=1)  # [S+A, 2Hp]
    b1 = jnp.concatenate([pad_cols(b1_1), pad_cols(b1_2)], axis=1)  # [1, 2Hp]
    # w3 kept f32 (after bf16 round-trip) so there is no per-tile cast.
    w3_1f = pad_cols(w3_1.T.astype(jnp.bfloat16).astype(jnp.float32))  # [1, Hp]
    w3_2f = pad_cols(w3_2.T.astype(jnp.bfloat16).astype(jnp.float32))
    return {
        "w1": w1.astype(jnp.bfloat16),                 # [S+A, 2Hp] bf16
        "b1": b1,                                      # [1, 2Hp]  f32
        "w2_q1": pad_both(w2_1).astype(jnp.bfloat16),  # [Hp, Hp]  bf16
        "b2_q1": pad_cols(b2_1),                       # [1, Hp]   f32
        "w2_q2": pad_both(w2_2).astype(jnp.bfloat16),
        "b2_q2": pad_cols(b2_2),
        "w3_q1": w3_1f,                                # [1, Hp]   f32
        "w3_q2": w3_2f,
        "b3": jnp.concatenate([b3_1, b3_2], axis=1),   # [1, 2]    f32
    }


def twinq_reference(state, action, raw):
    """Pure-JAX reference mirroring the kernel's bf16-weight numerics."""
    sa = jnp.concatenate([state, action], axis=1)

    def head(p):
        w1, b1, w2, b2, w3, b3 = p
        h1 = jnp.dot(sa.astype(jnp.bfloat16), w1.astype(jnp.bfloat16),
                     preferred_element_type=jnp.float32) + b1
        h1 = jnp.maximum(h1, 0.0)
        h2 = jnp.dot(h1.astype(jnp.bfloat16), w2.astype(jnp.bfloat16),
                     preferred_element_type=jnp.float32) + b2
        h2 = jnp.maximum(h2, 0.0)
        w3f = w3.astype(jnp.bfloat16).astype(jnp.float32).reshape(1, -1)
        return jnp.sum(h2 * w3f, axis=-1) + b3.reshape(())

    return head(raw["q1"]), head(raw["q2"])


if __name__ == "__main__":
    # Small shapes implied by forward(state [B, S], action [B, A]).
    B, STATE_DIM, ACTION_DIM, HIDDEN = 8, 16, 8, 32

    key = jax.random.PRNGKey(0)
    kp, ks, ka = jax.random.split(key, 3)

    raw_params = init_twinq(kp, STATE_DIM, ACTION_DIM,
                            hidden_dim=HIDDEN, n_hidden=2)
    packed_params = pack_twinq_params(raw_params)

    state = jax.random.normal(ks, (B, STATE_DIM), jnp.float32)
    action = jax.random.normal(ka, (B, ACTION_DIM), jnp.float32)

    q1, q2 = twinq_forward(state, action, packed_params)
    jax.block_until_ready((q1, q2))

    r1, r2 = twinq_reference(state, action, raw_params)
    assert q1.shape == (B,) and q2.shape == (B,)
    assert jnp.allclose(q1, r1, atol=1e-2, rtol=1e-2)
    assert jnp.allclose(q2, r2, atol=1e-2, rtol=1e-2)

    print("KERNEL_OK")
</pallas_src>

<mosaic_0001>
module attributes {stable_mosaic.version = 11 : i64} {
  func.func @twinq_kernel(%arg0: i32, %arg1: memref<8x24xbf16, #tpu.memory_space<vmem>>, %arg2: memref<24x256xbf16, #tpu.memory_space<vmem>>, %arg3: memref<1x256xf32, #tpu.memory_space<vmem>>, %arg4: memref<128x128xbf16, #tpu.memory_space<vmem>>, %arg5: memref<1x128xf32, #tpu.memory_space<vmem>>, %arg6: memref<128x128xbf16, #tpu.memory_space<vmem>>, %arg7: memref<1x128xf32, #tpu.memory_space<vmem>>, %arg8: memref<1x128xf32, #tpu.memory_space<vmem>>, %arg9: memref<1x128xf32, #tpu.memory_space<vmem>>, %arg10: memref<1x2xf32, #tpu.memory_space<smem>>, %arg11: memref<8x128xf32, #tpu.memory_space<vmem>>) attributes {dimension_semantics = [#tpu.dimension_semantics<parallel>], iteration_bounds = array<i64: 1>, scalar_prefetch = 0 : i64, scratch_operands = 0 : i64, tpu.core_type = #tpu.core_type<tc>, window_params = [{transform_indices = @transform_0, window_bounds = array<i64: 8, 24>}, {pipeline_mode = #tpu.pipeline_mode<synchronous>, transform_indices = @transform_1, window_bounds = array<i64: 24, 256>}, {pipeline_mode = #tpu.pipeline_mode<synchronous>, transform_indices = @transform_2, window_bounds = array<i64: 1, 256>}, {pipeline_mode = #tpu.pipeline_mode<synchronous>, transform_indices = @transform_3, window_bounds = array<i64: 128, 128>}, {pipeline_mode = #tpu.pipeline_mode<synchronous>, transform_indices = @transform_4, window_bounds = array<i64: 1, 128>}, {pipeline_mode = #tpu.pipeline_mode<synchronous>, transform_indices = @transform_5, window_bounds = array<i64: 128, 128>}, {pipeline_mode = #tpu.pipeline_mode<synchronous>, transform_indices = @transform_6, window_bounds = array<i64: 1, 128>}, {pipeline_mode = #tpu.pipeline_mode<synchronous>, transform_indices = @transform_7, window_bounds = array<i64: 1, 128>}, {pipeline_mode = #tpu.pipeline_mode<synchronous>, transform_indices = @transform_8, window_bounds = array<i64: 1, 128>}, {transform_indices = @transform_9, window_bounds = array<i64: 1, 2>}, {transform_indices = @transform_10, window_bounds = array<i64: 8, 128>}]} {
    %c0 = arith.constant 0 : index
    %c0_0 = arith.constant 0 : index
    %0 = vector.load %arg1[%c0, %c0_0] : memref<8x24xbf16, #tpu.memory_space<vmem>>, vector<8x24xbf16>
    %c0_1 = arith.constant 0 : index
    %c0_2 = arith.constant 0 : index
    %1 = vector.load %arg2[%c0_1, %c0_2] : memref<24x256xbf16, #tpu.memory_space<vmem>>, vector<24x256xbf16>
    %cst = arith.constant dense<0.000000e+00> : vector<8x256xf32>
    %2 = tpu.matmul %0, %1, %cst {dimension_numbers = #tpu.dot_dimension_numbers<[1], [0], [0], [1], [0, 0, 1, 1], [], []>} : vector<8x24xbf16>, vector<24x256xbf16>, vector<8x256xf32> -> vector<8x256xf32>
    %c0_3 = arith.constant 0 : index
    %c0_4 = arith.constant 0 : index
    %3 = vector.load %arg3[%c0_3, %c0_4] : memref<1x256xf32, #tpu.memory_space<vmem>>, vector<1x256xf32>
    %4 = vector.broadcast %3 : vector<1x256xf32> to vector<8x256xf32>
    %5 = arith.addf %2, %4 : vector<8x256xf32>
    %cst_5 = arith.constant 0.000000e+00 : f32
    %6 = vector.broadcast %cst_5 : f32 to vector<8x256xf32>
    %7 = arith.maximumf %5, %6 : vector<8x256xf32>
    %8 = arith.truncf %7 : vector<8x256xf32> to vector<8x256xbf16>
    %9 = vector.extract_strided_slice %8 {offsets = [0, 0], sizes = [8, 128], strides = [1, 1]} : vector<8x256xbf16> to vector<8x128xbf16>
    %10 = vector.extract_strided_slice %8 {offsets = [0, 128], sizes = [8, 128], strides = [1, 1]} : vector<8x256xbf16> to vector<8x128xbf16>
    %c0_6 = arith.constant 0 : index
    %c0_7 = arith.constant 0 : index
    %11 = vector.load %arg4[%c0_6, %c0_7] : memref<128x128xbf16, #tpu.memory_space<vmem>>, vector<128x128xbf16>
    %cst_8 = arith.constant dense<0.000000e+00> : vector<8x128xf32>
    %12 = tpu.matmul %9, %11, %cst_8 {dimension_numbers = #tpu.dot_dimension_numbers<[1], [0], [0], [1], [0, 0, 1, 1], [], []>} : vector<8x128xbf16>, vector<128x128xbf16>, vector<8x128xf32> -> vector<8x128xf32>
    %c0_9 = arith.constant 0 : index
    %c0_10 = arith.constant 0 : index
    %13 = vector.load %arg5[%c0_9, %c0_10] : memref<1x128xf32, #tpu.memory_space<vmem>>, vector<1x128xf32>
    %14 = vector.broadcast %13 : vector<1x128xf32> to vector<8x128xf32>
    %15 = arith.addf %12, %14 : vector<8x128xf32>
    %cst_11 = arith.constant 0.000000e+00 : f32
    %16 = vector.broadcast %cst_11 : f32 to vector<8x128xf32>
    %17 = arith.maximumf %15, %16 : vector<8x128xf32>
    %c0_12 = arith.constant 0 : index
    %c0_13 = arith.constant 0 : index
    %18 = vector.load %arg6[%c0_12, %c0_13] : memref<128x128xbf16, #tpu.memory_space<vmem>>, vector<128x128xbf16>
    %cst_14 = arith.constant dense<0.000000e+00> : vector<8x128xf32>
    %19 = tpu.matmul %10, %18, %cst_14 {dimension_numbers = #tpu.dot_dimension_numbers<[1], [0], [0], [1], [0, 0, 1, 1], [], []>} : vector<8x128xbf16>, vector<128x128xbf16>, vector<8x128xf32> -> vector<8x128xf32>
    %c0_15 = arith.constant 0 : index
    %c0_16 = arith.constant 0 : index
    %20 = vector.load %arg7[%c0_15, %c0_16] : memref<1x128xf32, #tpu.memory_space<vmem>>, vector<1x128xf32>
    %21 = vector.broadcast %20 : vector<1x128xf32> to vector<8x128xf32>
    %22 = arith.addf %19, %21 : vector<8x128xf32>
    %cst_17 = arith.constant 0.000000e+00 : f32
    %23 = vector.broadcast %cst_17 : f32 to vector<8x128xf32>
    %24 = arith.maximumf %22, %23 : vector<8x128xf32>
    %c0_18 = arith.constant 0 : index
    %c0_19 = arith.constant 0 : index
    %25 = vector.load %arg8[%c0_18, %c0_19] : memref<1x128xf32, #tpu.memory_space<vmem>>, vector<1x128xf32>
    %26 = vector.broadcast %25 : vector<1x128xf32> to vector<8x128xf32>
    %27 = arith.mulf %17, %26 : vector<8x128xf32>
    %cst_20 = arith.constant dense<0.000000e+00> : vector<8xf32>
    %28 = vector.multi_reduction <add>, %27, %cst_20 [1] : vector<8x128xf32> to vector<8xf32>
    %29 = vector.shape_cast %28 : vector<8xf32> to vector<8x1xf32>
    %c0_21 = arith.constant 0 : index
    %c0_22 = arith.constant 0 : index
    %30 = memref.load %arg10[%c0_21, %c0_22] : memref<1x2xf32, #tpu.memory_space<smem>>
    %31 = vector.broadcast %30 : f32 to vector<8x1xf32>
    %32 = arith.addf %29, %31 : vector<8x1xf32>
    %c0_23 = arith.constant 0 : index
    %c0_24 = arith.constant 0 : index
    %33 = vector.load %arg9[%c0_23, %c0_24] : memref<1x128xf32, #tpu.memory_space<vmem>>, vector<1x128xf32>
    %34 = vector.broadcast %33 : vector<1x128xf32> to vector<8x128xf32>
    %35 = arith.mulf %24, %34 : vector<8x128xf32>
    %cst_25 = arith.constant dense<0.000000e+00> : vector<8xf32>
    %36 = vector.multi_reduction <add>, %35, %cst_25 [1] : vector<8x128xf32> to vector<8xf32>
    %37 = vector.shape_cast %36 : vector<8xf32> to vector<8x1xf32>
    %c0_26 = arith.constant 0 : index
    %c1 = arith.constant 1 : index
    %38 = memref.load %arg10[%c0_26, %c1] : memref<1x2xf32, #tpu.memory_space<smem>>
    %39 = vector.broadcast %38 : f32 to vector<8x1xf32>
    %40 = arith.addf %37, %39 : vector<8x1xf32>
    %41 = tpu.iota {dimensions = array<i32: 1>} : vector<8x128xi32>
    %c0_i32 = arith.constant 0 : i32
    %42 = vector.broadcast %c0_i32 : i32 to vector<8x128xi32>
    %43 = arith.cmpi eq, %41, %42 : vector<8x128xi32>
    %cst_27 = arith.constant 0.000000e+00 : f32
    %44 = vector.shape_cast %32 : vector<8x1xf32> to vector<8x1xf32>
    %45 = vector.broadcast %44 : vector<8x1xf32> to vector<8x128xf32>
    %46 = vector.broadcast %cst_27 : f32 to vector<8x128xf32>
    %47 = arith.select %43, %45, %46 : vector<8x128xi1>, vector<8x128xf32>
    %c1_i32 = arith.constant 1 : i32
    %48 = vector.broadcast %c1_i32 : i32 to vector<8x128xi32>
    %49 = arith.cmpi eq, %41, %48 : vector<8x128xi32>
    %cst_28 = arith.constant 0.000000e+00 : f32
    %50 = vector.shape_cast %40 : vector<8x1xf32> to vector<8x1xf32>
    %51 = vector.broadcast %50 : vector<8x1xf32> to vector<8x128xf32>
    %52 = vector.broadcast %cst_28 : f32 to vector<8x128xf32>
    %53 = arith.select %49, %51, %52 : vector<8x128xi1>, vector<8x128xf32>
    %54 = arith.addf %47, %53 : vector<8x128xf32>
    %c0_29 = arith.constant 0 : index
    %c0_30 = arith.constant 0 : index
    %55 = vector.load %arg11[%c0_29, %c0_30] : memref<8x128xf32, #tpu.memory_space<vmem>>, vector<8x128xf32>
    tpu.vector_store %arg11[%c0_29, %c0_30], %54 {strides = array<i32>} : memref<8x128xf32, #tpu.memory_space<vmem>>, vector<8x128xf32>,
    return
  }
  func.func @transform_0(%arg0: i32) -> (i32, i32) {
    %c0_i32 = arith.constant 0 : i32
    %c0_i32_0 = arith.constant 0 : i32
    return %arg0, %c0_i32 : i32, i32
  }
  func.func @transform_1(%arg0: i32) -> (i32, i32) {
    %c0_i32 = arith.constant 0 : i32
    %c0_i32_0 = arith.constant 0 : i32
    %c0_i32_1 = arith.constant 0 : i32
    return %c0_i32, %c0_i32_0 : i32, i32
  }
  func.func @transform_2(%arg0: i32) -> (i32, i32) {
    %c0_i32 = arith.constant 0 : i32
    %c0_i32_0 = arith.constant 0 : i32
    %c0_i32_1 = arith.constant 0 : i32
    return %c0_i32, %c0_i32_0 : i32, i32
  }
  func.func @transform_3(%arg0: i32) -> (i32, i32) {
    %c0_i32 = arith.constant 0 : i32
    %c0_i32_0 = arith.constant 0 : i32
    %c0_i32_1 = arith.constant 0 : i32
    return %c0_i32, %c0_i32_0 : i32, i32
  }
  func.func @transform_4(%arg0: i32) -> (i32, i32) {
    %c0_i32 = arith.constant 0 : i32
    %c0_i32_0 = arith.constant 0 : i32
    %c0_i32_1 = arith.constant 0 : i32
    return %c0_i32, %c0_i32_0 : i32, i32
  }
  func.func @transform_5(%arg0: i32) -> (i32, i32) {
    %c0_i32 = arith.constant 0 : i32
    %c0_i32_0 = arith.constant 0 : i32
    %c0_i32_1 = arith.constant 0 : i32
    return %c0_i32, %c0_i32_0 : i32, i32
  }
  func.func @transform_6(%arg0: i32) -> (i32, i32) {
    %c0_i32 = arith.constant 0 : i32
    %c0_i32_0 = arith.constant 0 : i32
    %c0_i32_1 = arith.constant 0 : i32
    return %c0_i32, %c0_i32_0 : i32, i32
  }
  func.func @transform_7(%arg0: i32) -> (i32, i32) {
    %c0_i32 = arith.constant 0 : i32
    %c0_i32_0 = arith.constant 0 : i32
    %c0_i32_1 = arith.constant 0 : i32
    return %c0_i32, %c0_i32_0 : i32, i32
  }
  func.func @transform_8(%arg0: i32) -> (i32, i32) {
    %c0_i32 = arith.constant 0 : i32
    %c0_i32_0 = arith.constant 0 : i32
    %c0_i32_1 = arith.constant 0 : i32
    return %c0_i32, %c0_i32_0 : i32, i32
  }
  func.func @transform_9(%arg0: i32) -> (i32, i32) {
    %c0_i32 = arith.constant 0 : i32
    %c0_i32_0 = arith.constant 0 : i32
    %c0_i32_1 = arith.constant 0 : i32
    return %c0_i32, %c0_i32_0 : i32, i32
  }
  func.func @transform_10(%arg0: i32) -> (i32, i32) {
    %c0_i32 = arith.constant 0 : i32
    %c0_i32_0 = arith.constant 0 : i32
    return %arg0, %c0_i32 : i32, i32
  }
}

</mosaic_0001>

<bundles_post_ra>
// kernel: twinq_forward.1
= control target key start
LH: loop header
LB: loop body
LE: loop exit
PB: predicated region body
PF: predicated region fallthrough
CT: control target
= control target key end

     0   :  { %15 = vsyncpa [#allocation3], 0  ;;  %s1096_s0 = inlined_call_operand.hbm [shape: bf16[8,24], index: 0, kind: input, shape index: {}]   ;;  %s1097_s1 = inlined_call_operand.hbm [shape: bf16[24,256], index: 1, kind: input, shape index: {}]   ;;  %s1098_s2 = inlined_call_operand.hbm [shape: f32[1,256], index: 2, kind: input, shape index: {}]   ;;  %s1099_s3 = inlined_call_operand.hbm [shape: bf16[128,128], index: 3, kind: input, shape index: {}]   ;;  %s1100_s4 = inlined_call_operand.hbm [shape: f32[1,128], index: 4, kind: input, shape index: {}]   ;;  %s1101_s5 = inlined_call_operand.hbm [shape: bf16[128,128], index: 5, kind: input, shape index: {}]   ;;  %s1102_s6 = inlined_call_operand.hbm [shape: f32[1,128], index: 6, kind: input, shape index: {}]   ;;  %s1103_s7 = inlined_call_operand.hbm [shape: f32[1,128], index: 7, kind: input, shape index: {}]   ;;  %s1104_s8 = inlined_call_operand.hbm [shape: f32[1,128], index: 8, kind: input, shape index: {}]   ;;  %s1105_s9 = inlined_call_operand.hbm [shape: f32[1,2], index: 9, kind: input, shape index: {}]   ;;  %s1106_s10 = inlined_call_operand.hbm [shape: f32[8,128], index: 10, kind: output, shape index: {}]  }
   0x1   :  { %16 = vsyncpa [#allocation7], 0 }
   0x2   :  { %17 = vsyncpa [#allocation10], 0 }
   0x3   :  { %18 = vsyncpa [#allocation13], 0 }
   0x4   :  { %19 = vsyncpa [#allocation16], 0 }
   0x5   :  { %20 = vsyncpa [#allocation5], 0 }
   0x6   :  { %21 = vsyncpa [#allocation4], 0  ;;  %s891_s13 = smov [#allocation6]   ;;  %s647_s17 = scalar_lea.hbm %s1097_s1, 384 }
   0x7   :  { %s37_s14 = sshll.u32 %s891_s13, 4  ;;  %p648_p0 = scmp.ne.s32.totalorder %s1097_s1, %s647_s17  ;;  %s38_s14 = int_to_ptr.vmem [resolvable:$true] %s37_s14 }
   0x8   :  { %p651_p1 = scmp.lt.u32.totalorder %s647_s17, %s1097_s1 }
   0xa   :  { %p653_p2 = pnand %p651_p1, %p648_p0 }
   0xc   :  { %656 = shalt.err (!%p653_p2)
}
   0xd   :  { %s657_s22 = scalar_lea.vmem %s38_s14, 384  ;;  %p662_p4 = scmp.lt.s32.totalorder %s38_s14, %s38_s14 }
   0xe   :  { %p658_p3 = scmp.ne.s32.totalorder %s38_s14, %s657_s22  ;;  %p663_p5 = scmp.lt.s32.totalorder %s657_s22, %s657_s22 }
  0x10   :  { %p664_p6 = por %p663_p5, %p662_p4 }
  0x12   :  { %p665_p7 = pnand %p664_p6, %p658_p3 }
  0x14   :  { %668 = shalt.err (!%p665_p7)
}
  0x15   :  { %s892_s23 = smov 128   ;;  %s893_s24 = smov 8  }
  0x16   :  { %43 = dma.hbm_to_vmem [thread:$0]  %s1097_s1, 384, %s38_s14, [#allocation7], %s892_s23, %s892_s23, %s893_s24  }
  0x17   :  { %s894_s27 = smov [#allocation9]   ;;  %s669_s11 = scalar_lea.hbm %s1099_s3, 1024 }
  0x18   :  { %s59_s28 = sshll.u32 %s894_s27, 4  ;;  %p670_p8 = scmp.ne.s32.totalorder %s1099_s3, %s669_s11  ;;  %s60_s28 = int_to_ptr.vmem [resolvable:$true] %s59_s28 }
  0x19   :  { %p673_p9 = scmp.lt.u32.totalorder %s669_s11, %s1099_s3 }
  0x1b   :  { %p675_p10 = pnand %p673_p9, %p670_p8 }
  0x1d   :  { %678 = shalt.err (!%p675_p10)
}
  0x1e   :  { %s679_s17 = scalar_lea.vmem %s60_s28, 1024  ;;  %p684_p12 = scmp.lt.s32.totalorder %s60_s28, %s60_s28 }
  0x1f   :  { %p680_p11 = scmp.ne.s32.totalorder %s60_s28, %s679_s17  ;;  %p685_p13 = scmp.lt.s32.totalorder %s679_s17, %s679_s17 }
  0x21   :  { %p686_p0 = por %p685_p13, %p684_p12 }
  0x23   :  { %p687_p1 = pnand %p686_p0, %p680_p11 }
  0x25   :  { %690 = shalt.err (!%p687_p1)
}
  0x26   :  { %s895_s1 = smov 64   ;;  %s896_s14 = smov 4  }
  0x27   :  { %65 = dma.hbm_to_vmem [thread:$0]  %s1099_s3, 1024, %s60_s28, [#allocation10], %s895_s1, %s895_s1, %s896_s14  }
  0x28   :  { %s897_s20 = smov [#allocation12]   ;;  %s898_s22 = smov [#allocation15]  }
  0x29   :  { %s81_s21 = sshll.u32 %s897_s20, 4  ;;  %s104_s23 = sshll.u32 %s898_s22, 4  ;;  %s82_s21 = int_to_ptr.vmem [resolvable:$true] %s81_s21  ;;  %s105_s23 = int_to_ptr.vmem [resolvable:$true] %s104_s23 }
  0x2a   :  { %s691_s26 = scalar_lea.hbm %s1101_s5, 1024 }
  0x2b   :  { %p692_p2 = scmp.ne.s32.totalorder %s1101_s5, %s691_s26  ;;  %p695_p3 = scmp.lt.u32.totalorder %s691_s26, %s1101_s5 }
  0x2d   :  { %p697_p4 = pnand %p695_p3, %p692_p2 }
  0x2f   :  { %700 = shalt.err (!%p697_p4)
}
  0x30   :  { %s701_s3 = scalar_lea.vmem %s82_s21, 1024  ;;  %p706_p6 = scmp.lt.s32.totalorder %s82_s21, %s82_s21 }
  0x31   :  { %p702_p5 = scmp.ne.s32.totalorder %s82_s21, %s701_s3  ;;  %p707_p7 = scmp.lt.s32.totalorder %s701_s3, %s701_s3 }
  0x33   :  { %p708_p8 = por %p707_p7, %p706_p6 }
  0x35   :  { %p709_p9 = pnand %p708_p8, %p702_p5 }
  0x37   :  { %712 = shalt.err (!%p709_p9)
}
  0x38   :  { %87 = dma.hbm_to_vmem [thread:$0]  %s1101_s5, 1024, %s82_s21, [#allocation13], %s895_s1, %s895_s1, %s896_s14  }
  0x39   :  { %s713_s16 = scalar_lea.hbm %s1103_s7, 16 }
  0x3a   :  { %p714_p10 = scmp.ne.s32.totalorder %s1103_s7, %s713_s16  ;;  %p717_p11 = scmp.lt.u32.totalorder %s713_s16, %s1103_s7 }
  0x3c   :  { %p719_p12 = pnand %p717_p11, %p714_p10 }
  0x3e   :  { %722 = shalt.err (!%p719_p12)
}
  0x3f   :  { %s723_s22 = scalar_lea.vmem %s105_s23, 16  ;;  %s727_s24 = scalar_lea.vmem %s105_s23, 32 }
  0x40   :  { %p724_p13 = scmp.ne.s32.totalorder %s105_s23, %s723_s22  ;;  %p728_p0 = scmp.lt.s32.totalorder %s105_s23, %s105_s23 }
  0x41   :  { %p729_p1 = scmp.lt.s32.totalorder %s727_s24, %s723_s22 }
  0x43   :  { %p730_p2 = por %p729_p1, %p728_p0 }
  0x45   :  { %p731_p3 = pnand %p730_p2, %p724_p13 }
  0x47   :  { %734 = shalt.err (!%p731_p3)
}
  0x48   :  { %107 = dma.hbm_to_vmem [thread:$0]  %s1103_s7, 16, %s105_s23, [#allocation16]  }
  0x49   :  { %s899_s14 = smov [#allocation2]   ;;  %s900_s25 = smov [#allocation8]  }
  0x4a   :  { %s28_s21 = sshll.u32 %s899_s14, 4  ;;  %s50_s26 = sshll.u32 %s900_s25, 4  ;;  %s29_s21 = int_to_ptr.vmem [resolvable:$true] %s28_s21  ;;  %s51_s26 = int_to_ptr.vmem [resolvable:$true] %s50_s26 }
  0x4b   :  { %s735_s30 = scalar_lea.hbm %s1096_s0, 64 }
  0x4c   :  { %p736_p4 = scmp.ne.s32.totalorder %s1096_s0, %s735_s30  ;;  %p739_p5 = scmp.lt.u32.totalorder %s735_s30, %s1096_s0 }
  0x4e   :  { %p741_p6 = pnand %p739_p5, %p736_p4 }
  0x50   :  { %744 = shalt.err (!%p741_p6)
}
  0x51   :  { %s745_s7 = scalar_lea.vmem %s29_s21, 64  ;;  %p750_p8 = scmp.lt.s32.totalorder %s29_s21, %s29_s21 }
  0x52   :  { %p746_p7 = scmp.ne.s32.totalorder %s29_s21, %s745_s7  ;;  %p751_p9 = scmp.lt.s32.totalorder %s745_s7, %s745_s7 }
  0x54   :  { %p752_p10 = por %p751_p9, %p750_p8 }
  0x56   :  { %p753_p11 = pnand %p752_p10, %p746_p7 }
  0x58   :  { %756 = shalt.err (!%p753_p11)
}
  0x59   :  { %31 = dma.hbm_to_vmem [thread:$0]  %s1096_s0, 64, %s29_s21, [#allocation3]  }
  0x5a   :  { %s757_s17 = scalar_lea.hbm %s1098_s2, 32 }
  0x5b   :  { %p758_p12 = scmp.ne.s32.totalorder %s1098_s2, %s757_s17  ;;  %p761_p13 = scmp.lt.u32.totalorder %s757_s17, %s1098_s2 }
  0x5d   :  { %p763_p0 = pnand %p761_p13, %p758_p12 }
  0x5f   :  { %766 = shalt.err (!%p763_p0)
}
  0x60   :  { %s767_s24 = scalar_lea.vmem %s51_s26, 32  ;;  %p772_p2 = scmp.lt.s32.totalorder %s51_s26, %s51_s26 }
  0x61   :  { %p768_p1 = scmp.ne.s32.totalorder %s51_s26, %s767_s24  ;;  %p773_p3 = scmp.lt.s32.totalorder %s767_s24, %s767_s24 }
  0x63   :  { %p774_p4 = por %p773_p3, %p772_p2 }
  0x65   :  { %p775_p5 = pnand %p774_p4, %p768_p1 }
  0x67   :  { %778 = shalt.err (!%p775_p5)
}
  0x68   :  { %53 = dma.hbm_to_vmem [thread:$0]  %s1098_s2, 32, %s51_s26, [#allocation7]  }
  0x69   :  { %s901_s1 = smov [#allocation11]   ;;  %s902_s21 = smov [#allocation14]  }
  0x6a   :  { %s72_s14 = sshll.u32 %s901_s1, 4  ;;  %s94_s25 = sshll.u32 %s902_s21, 4  ;;  %s73_s14 = int_to_ptr.vmem [resolvable:$true] %s72_s14  ;;  %s95_s25 = int_to_ptr.vmem [resolvable:$true] %s94_s25 }
  0x6b   :  { %s779_s30 = scalar_lea.hbm %s1100_s4, 16 }
  0x6c   :  { %p780_p6 = scmp.ne.s32.totalorder %s1100_s4, %s779_s30  ;;  %p783_p7 = scmp.lt.u32.totalorder %s779_s30, %s1100_s4 }
  0x6e   :  { %p785_p8 = pnand %p783_p7, %p780_p6 }
  0x70   :  { %788 = shalt.err (!%p785_p8)
}
  0x71   :  { %s789_s2 = scalar_lea.vmem %s73_s14, 16  ;;  %s793_s26 = scalar_lea.vmem %s73_s14, 32 }
  0x72   :  { %p790_p9 = scmp.ne.s32.totalorder %s73_s14, %s789_s2  ;;  %p794_p10 = scmp.lt.s32.totalorder %s73_s14, %s73_s14 }
  0x73   :  { %p795_p11 = scmp.lt.s32.totalorder %s793_s26, %s789_s2 }
  0x75   :  { %p796_p12 = por %p795_p11, %p794_p10 }
  0x77   :  { %p797_p13 = pnand %p796_p12, %p790_p9 }
  0x79   :  { %800 = shalt.err (!%p797_p13)
}
  0x7a   :  { %75 = dma.hbm_to_vmem [thread:$0]  %s1100_s4, 16, %s73_s14, [#allocation10]  }
  0x7b   :  { %s801_s16 = scalar_lea.hbm %s1102_s6, 16 }
  0x7c   :  { %p802_p0 = scmp.ne.s32.totalorder %s1102_s6, %s801_s16  ;;  %p805_p1 = scmp.lt.u32.totalorder %s801_s16, %s1102_s6 }
  0x7e   :  { %p807_p2 = pnand %p805_p1, %p802_p0 }
  0x80   :  { %810 = shalt.err (!%p807_p2)
}
  0x81   :  { %s811_s22 = scalar_lea.vmem %s95_s25, 16  ;;  %s815_s24 = scalar_lea.vmem %s95_s25, 32 }
  0x82   :  { %p812_p3 = scmp.ne.s32.totalorder %s95_s25, %s811_s22  ;;  %p816_p4 = scmp.lt.s32.totalorder %s95_s25, %s95_s25 }
  0x83   :  { %p817_p5 = scmp.lt.s32.totalorder %s815_s24, %s811_s22 }
  0x85   :  { %p818_p6 = por %p817_p5, %p816_p4 }
  0x87   :  { %p819_p7 = pnand %p818_p6, %p812_p3 }
  0x89   :  { %822 = shalt.err (!%p819_p7)
}
  0x8a   :  { %97 = dma.hbm_to_vmem [thread:$0]  %s1102_s6, 16, %s95_s25, [#allocation13]  }
  0x8b   :  { %s903_s5 = smov [#allocation17]   ;;  %s823_s27 = scalar_lea.hbm %s1104_s8, 16 }
  0x8c   :  { %s114_s1 = sshll.u32 %s903_s5, 4  ;;  %p824_p8 = scmp.ne.s32.totalorder %s1104_s8, %s823_s27  ;;  %s115_s1 = int_to_ptr.vmem [resolvable:$true] %s114_s1 }
  0x8d   :  { %p827_p9 = scmp.lt.u32.totalorder %s823_s27, %s1104_s8 }
  0x8f   :  { %p829_p10 = pnand %p827_p9, %p824_p8 }
  0x91   :  { %832 = shalt.err (!%p829_p10)
}
  0x92   :  { %s833_s28 = scalar_lea.vmem %s115_s1, 16  ;;  %s837_s6 = scalar_lea.vmem %s115_s1, 32 }
  0x93   :  { %p834_p11 = scmp.ne.s32.totalorder %s115_s1, %s833_s28  ;;  %p838_p12 = scmp.lt.s32.totalorder %s115_s1, %s115_s1 }
  0x94   :  { %p839_p13 = scmp.lt.s32.totalorder %s837_s6, %s833_s28 }
  0x96   :  { %p840_p0 = por %p839_p13, %p838_p12 }
  0x98   :  { %p841_p1 = pnand %p840_p0, %p834_p11 }
  0x9a   :  { %844 = shalt.err (!%p841_p1)
}
  0x9b   :  { %117 = dma.hbm_to_vmem [thread:$0]  %s1104_s8, 16, %s115_s1, [#allocation16]  }
  0x9c   :  { %s845_s7 = scalar_lea.hbm %s1105_s9, 16 }
  0x9d   :  { %p846_p2 = scmp.ne.s32.totalorder %s1105_s9, %s845_s7  ;;  %p849_p3 = scmp.lt.u32.totalorder %s845_s7, %s1105_s9 }
  0x9f   :  { %p851_p4 = pnand %p849_p3, %p846_p2 }
  0xa1   :  { %854 = shalt.err (!%p851_p4)
}
  0xa2   :  { %s904_s17 = smov [#allocation18]  }
  0xa3   :  { %125 = dma.hbm_to_smem %s1105_s9, 16, %s904_s17, [#allocation5]  }
  0xa4   :  { %877 = dma.done.wait [#allocation3], 64  }
  0xa5   :  { %878 = vsyncadd [#allocation3], 4294967232 }
  0xa6   :  { %879 = dma.done.wait [#allocation7], 416  }
  0xa7   :  { %880 = vsyncadd [#allocation7], 4294966880 }
  0xa8   :  { %881 = dma.done.wait [#allocation10], 1040  }
  0xa9   :  { %882 = vsyncadd [#allocation10], 4294966256 }
  0xaa   :  { %883 = dma.done.wait [#allocation13], 1040  }
  0xab   :  { %884 = vsyncadd [#allocation13], 4294966256 }
  0xac   :  { %885 = dma.done.wait [#allocation16], 32  }
  0xad   :  { %886 = vsyncadd [#allocation16], 4294967264 }
  0xae   :  { %887 = dma.done.wait [#allocation5], 16  }
  0xaf   :  { %888 = vsyncadd [#allocation5], 4294967280 }
  0xb0   :  { %156 = sfence }
  0xb1   :  { %v626_v0 = vld [vmem:[#allocation6 + $0x4] ss:$8 sps:$4 sm:$0xff]   ;;  %v628_v1 = vld [vmem:[#allocation6] ss:$8 sps:$4 sm:$0xff]   ;;  %v161_v2 = vld [vmem:[#allocation6 + $0x10] sm:$0xff]  ;;  %vm193_vm0 = vcmask 1043456   ;;  %v164_v25 = vlaneseq }
  0xb2   :  { %v905_v3 = vmov 0   ;;  %200 = vmatprep.subr.bf16.mxu0 %v626_v0  ;;  %v526_v4 = vcombine.high %v161_v2, %v161_v2  ;;  %v525_v5 = vcombine.low %v161_v2, %v161_v2  ;;  %v631_v6 = vld [vmem:[#allocation9] sm:$0xff]   ;;  %v906_v7 = vmov 0.0   ;;  %v633_v9 = vld [vmem:[#allocation9 + $0x8] sm:$0xff]   ;;  %v635_v12 = vld [vmem:[#allocation9 + $0x10] sm:$0xff]   ;;  %s479_s8 = sld [smem:[#allocation18]] }
  0xb3   :  { %232 = vmatprep.mubr.bf16.mxu0 %v905_v3  ;;  %201 = vmatpush1.bf16.msra.mxu0 %v628_v1  ;;  %v158_v10 = vld [vmem:[#allocation2] sm:$0xf]  ;;  %vm189_vm1 = vcmask 195584   ;;  %v634_v13 = vld [vmem:[#allocation12 + $0x8] sm:$0xff]   ;;  %v637_v14 = vld [vmem:[#allocation9 + $0x18] sm:$0xff]   ;;  %vm907_vm2 = vmmov 0  }
  0xb4   :  { %568 = vmatprep.subr.bf16.mxu1 %v906_v7  ;;  %527 = vmatprep.subr.msk.bf16.mxu0 %vm193_vm0, %v526_v4  ;;  %v195_v8 = vsel %vm193_vm0, %v525_v5, 0  ;;  %v632_v11 = vld [vmem:[#allocation12] sm:$0xff]   ;;  %v636_v15 = vld [vmem:[#allocation12 + $0x10] sm:$0xff]   ;;  %v638_v17 = vld [vmem:[#allocation12 + $0x18] sm:$0xff]   ;;  %v165_v26 = vshrl.u32 %v164_v25, 7  ;;  %s549_s9 = sld [smem:[#allocation18 + $0x1]] }
  0xb5   :  { %569 = vmatpush3.bf16.msra.mxu1 %v631_v6  ;;  %v639_v16 = vld [vmem:[#allocation9 + $0x20] sm:$0xff]   ;;  %v641_v18 = vld [vmem:[#allocation9 + $0x28] sm:$0xff]   ;;  %v643_v21 = vld [vmem:[#allocation9 + $0x30] sm:$0xff]   ;;  %584 = vmatprep.mubr.msk.bf16.mxu1 %vm907_vm2, %v906_v7  ;;  %v496_v62 = vand.u32 127, %v164_v25  ;;  %s908_s20 = smov [#allocation19]  }
  0xb6   :  { %570 = vmatprep.subr.bf16.mxu1 %v906_v7  ;;  %v640_v19 = vld [vmem:[#allocation12 + $0x20] sm:$0xff]   ;;  %v642_v20 = vld [vmem:[#allocation12 + $0x28] sm:$0xff]   ;;  %v644_v22 = vld [vmem:[#allocation12 + $0x30] sm:$0xff]   ;;  %v166_v27 = vsub.s32 0, %v165_v26  ;;  %v170_v29 = vsub.s32 1, %v165_v26  ;;  %s509_s22 = sshll.u32 %s908_s20, 4  ;;  %s510_s22 = int_to_ptr.vmem [resolvable:$true] %s509_s22 }
  0xb7   :  { %203 = vmatpush1.bf16.msra.mxu0 %v195_v8  ;;  %v645_v23 = vld [vmem:[#allocation9 + $0x38] sm:$0xff]   ;;  %v529_v42 = vld [vmem:[#allocation11] ss:$0 sm:$0xff]  ;;  %v538_v43 = vld [vmem:[#allocation14] ss:$0 sm:$0xff]  ;;  %vm497_vm3 = vcmp.eq.s32.totalorder %v496_v62, 0  ;;  %p860_p6 = scmp.lt.s32.totalorder %s510_s22, %s510_s22 }
  0xb8   :  { %588 = vmatprep.subr.bf16.mxu0 %v906_v7  ;;  %v646_v24 = vld [vmem:[#allocation12 + $0x38] sm:$0xff]   ;;  %v547_v51 = vld [vmem:[#allocation15] ss:$0 sm:$0xff]  ;;  %v548_v58 = vld [vmem:[#allocation17] ss:$0 sm:$0xff]  ;;  %v480_v60 = vstv %s479_s8  ;;  %vm499_vm4 = vcmp.eq.s32.totalorder %v496_v62, 1 }
  0xb9   :  { %571 = vmatpush3.bf16.msra.mxu1 %v633_v9  ;;  %v162_v28 = vld [vmem:[#allocation8] sm:$0x3]  ;;  %s855_s24 = scalar_lea.vmem %s510_s22, 128 }
  0xba   :  { %572 = vmatprep.subr.bf16.mxu1 %v906_v7  ;;  %528 = vmatmul.mubr.msk.bf16.vlgmr.msra.gmra.mrb[0].mxu0 %vm189_vm1, %v158_v10  ;;  %v167_v30 = vrot.slane %v162_v28, %v166_v27  ;;  %v171_v31 = vrot.slane %v162_v28, %v170_v29  ;;  %v493_v63 = vstv %s549_s9  ;;  %p856_p5 = scmp.ne.s32.totalorder %s510_s22, %s855_s24  ;;  %p861_p7 = scmp.lt.s32.totalorder %s855_s24, %s855_s24 }
  0xbb   :  { %589 = vmatpush3.bf16.msra.mxu0 %v632_v11  ;;  %604 = vmatprep.mubr.msk.bf16.mxu0 %vm907_vm2, %v906_v7 }
  0xbc   :  { %590 = vmatprep.subr.bf16.mxu0 %v906_v7  ;;  %p862_p8 = por %p861_p7, %p860_p6 }
  0xbd   :  { %573 = vmatpush3.bf16.msra.mxu1 %v635_v12 }
  0xbe   :  { %574 = vmatprep.subr.bf16.mxu1 %v906_v7  ;;  %p863_p9 = pnand %p862_p8, %p856_p5 }
  0xbf   :  { %591 = vmatpush3.bf16.msra.mxu0 %v634_v13 }
  0xc0   :  { %592 = vmatprep.subr.bf16.mxu0 %v906_v7 }
  0xc1   :  { %575 = vmatpush3.bf16.msra.mxu1 %v637_v14 }
  0xc2   :  { %576 = vmatprep.subr.bf16.mxu1 %v906_v7 }
  0xc3   :  { %593 = vmatpush3.bf16.msra.mxu0 %v636_v15 }
  0xc4   :  { %594 = vmatprep.subr.bf16.mxu0 %v906_v7 }
  0xc5   :  { %577 = vmatpush3.bf16.msra.mxu1 %v639_v16 }
  0xc6   :  { %578 = vmatprep.subr.bf16.mxu1 %v906_v7 }
  0xc7   :  { %595 = vmatpush3.bf16.msra.mxu0 %v638_v17 }
  0xc8   :  { %596 = vmatprep.subr.bf16.mxu0 %v906_v7 }
  0xc9   :  { %579 = vmatpush3.bf16.msra.mxu1 %v641_v18 }
  0xca   :  { %580 = vmatprep.subr.bf16.mxu1 %v906_v7 }
  0xcb   :  { %597 = vmatpush3.bf16.msra.mxu0 %v640_v19 }
  0xcc   :  { %598 = vmatprep.subr.bf16.mxu0 %v906_v7 }
  0xcd   :  { %581 = vmatpush3.bf16.msra.mxu1 %v643_v21 }
  0xce   :  { %582 = vmatprep.subr.bf16.mxu1 %v906_v7 }
  0xcf   :  { %599 = vmatpush3.bf16.msra.mxu0 %v642_v20 }
  0xd0   :  { %600 = vmatprep.subr.bf16.mxu0 %v906_v7 }
  0xd1   :  { %583 = vmatpush3.bf16.msra.mxu1 %v645_v23 }
  0xd3   :  { %601 = vmatpush3.bf16.msra.mxu0 %v644_v22 }
  0xd4   :  { %602 = vmatprep.subr.bf16.mxu0 %v906_v7 }
  0xd7   :  { %603 = vmatpush3.bf16.msra.mxu0 %v646_v24 }
 0x18d   :  { %v234_v32 = vpop.f32.mrb[0].mxu0 }
 0x18e   :  { %v235_v33 = vadd.f32 %v234_v32, %v167_v30  ;;  %v236_v34 = vpop.f32.mrb[1].mxu0 }
 0x18f   :  { %v237_v35 = vadd.f32 %v236_v34, %v171_v31  ;;  %v238_v36 = vpop.f32.mrb[2].mxu0 }
 0x190   :  { %v241_v37 = vmax.f32 %v235_v33, 0.0  ;;  %v239_v38 = vpop.f32.mrb[3].mxu0 }
 0x191   :  { %v242_v39 = vmax.f32 %v237_v35, 0.0 }
 0x192   :  { %v243_v40 = vpack.c.bf16 %v241_v37, %v241_v37 }
 0x193   :  { %v244_v41 = vpack.c.bf16 %v242_v39, %v242_v39 }
 0x194   :  { %585 = vmatmul.mubr.bf16.vlgmr.msra.gmra.mrb[0].mxu1 %v243_v40 }
 0x195   :  { %605 = vmatmul.mubr.bf16.vlgmr.msra.gmra.mrb[4].mxu0 %v244_v41 }
 0x267   :  { %v350_v44 = vpop.f32.mrb[0].mxu1 }
 0x268   :  { %v351_v45 = vadd.f32 %v529_v42, %v350_v44  ;;  %v586_v46 = vpop.f32.mrb[1].mxu1  ;;  %v462_v47 = vpop.f32.mrb[4].mxu0 }
 0x269   :  { %v463_v48 = vadd.f32 %v538_v43, %v462_v47  ;;  %v353_v49 = vpop.f32.mrb[2].mxu1  ;;  %v606_v50 = vpop.f32.mrb[5].mxu0 }
 0x26a   :  { %v356_v52 = vmax.f32 %v351_v45, 0.0  ;;  %v587_v53 = vpop.f32.mrb[3].mxu1  ;;  %v465_v54 = vpop.f32.mrb[6].mxu0 }
 0x26b   :  { %v607_v55 = vpop.f32.mrb[7].mxu0  ;;  %v468_v56 = vmax.f32 %v463_v48, 0.0 }
 0x26c   :  { %v476_v57 = vmul.f32 %v547_v51, %v356_v52 }
 0x26d   :  { %v489_v59 = vmul.f32 %v548_v58, %v468_v56 }
 0x26e   :  { %477 = vadd.xlane.f32.xlu0 %v476_v57 }
 0x272   :  { %490 = vadd.xlane.f32.xlu0 %v489_v59 }
 0x2fb   :  { %v478_v61 = vpop.xlane.xlu0 %477 }
 0x2fc   :  { %v481_v0 = vadd.f32 %v480_v60, %v478_v61 }
 0x2fe   :  { %v498_v3 = vsel %vm497_vm3, %v481_v0, 0.0 }
 0x2ff   :  { %v491_v1 = vpop.xlane.xlu0 %490 }
 0x300   :  { %v494_v2 = vadd.f32 %v493_v63, %v491_v1 }
 0x302   :  { %v500_v4 = vsel %vm499_vm4, %v494_v2, 0.0 }
 0x303   :  { %v501_v5 = vadd.f32 %v500_v4, %v498_v3 }
 0x305   :  { %502 = vst [vmem:[#allocation19] sm:$0xff] %v501_v5 }
 0x306   :  { %866 = shalt.err (!%p863_p9)
}
 0x307   :  { %s867_s5 = scalar_lea.hbm %s1106_s10, 128 }
 0x308   :  { %p868_p10 = scmp.ne.s32.totalorder %s1106_s10, %s867_s5  ;;  %p871_p11 = scmp.lt.u32.totalorder %s867_s5, %s1106_s10 }
 0x30a   :  { %p873_p12 = pnand %p871_p11, %p868_p10 }
 0x30c   :  { %876 = shalt.err (!%p873_p12)
}
 0x30d   :  { %512 = dma.vmem_to_hbm [thread:$0]  %s510_s22, 128, %s1106_s10, [#allocation4]  }
 0x30e   :  { %889 = dma.done.wait [#allocation4], 128  }
 0x30f   :  { %890 = vsyncadd [#allocation4], 4294967168 }
 0x310   :  { %516 = vsyncpa [#allocation3], 1 }
 0x311   :  { %517 = vsyncpa [#allocation7], 1 }
 0x312   :  { %518 = vsyncpa [#allocation10], 1 }
 0x313   :  { %519 = vsyncpa [#allocation13], 1 }
 0x314   :  { %520 = vsyncpa [#allocation16], 1 }
 0x315   :  { %521 = vsyncpa [#allocation4], 1 }
 0x316   :  { %522 = vsyncpa [#allocation5], 1 }

</bundles_post_ra>
